<compile_context>
chip_gen: v6e
topology: v6e:2x2x1
jax: 0.10.0
libtpu: 0.0.40
codegen_flags: <defaults>
</compile_context>

<pallas_src>
import functools

import jax
import jax.numpy as jnp
from jax.experimental import pallas as pl
from jax.experimental.pallas import tpu as pltpu


def _round_up(x, m):
    return -(-x // m) * m


def _vmem_cap_bytes():
    """Per-generation scoped-VMEM cap: physical VMEM minus ~24 MiB headroom."""
    try:
        phys = int(pltpu.get_tpu_info().vmem_capacity_bytes)
    except Exception:
        phys = 64 * 2**20  # conservative default (v7x per-TC VMEM)
    return max(phys - 24 * 2**20, 40 * 2**20)


def _resident_spec(block_shape, index_map):
    """BlockSpec for a grid-invariant operand: single-buffered if supported."""
    try:
        return pl.BlockSpec(block_shape, index_map, pipeline_mode=pl.Buffered(1))
    except (TypeError, AttributeError):
        return pl.BlockSpec(block_shape, index_map)


def _mlp_kernel_resident(x_ref, w1_ref, b1_ref, w2_ref, b2_ref, w3_ref, b3_ref,
                         o_ref):
    """Fused 3-layer MLP on one row tile, all weights resident in VMEM.

    Matmuls accumulate in f32 on the MXU; bias add + ReLU stay f32 on the VPU.
    x / intermediates are cast to the weight dtype in-kernel so the MXU runs
    at bf16 throughput when bf16 weights are supplied.
    """
    wdt = w1_ref.dtype
    x = x_ref[...].astype(wdt)  # in-kernel cast: VPU work hidden under the MXU
    h = jnp.dot(x, w1_ref[...], preferred_element_type=jnp.float32)
    h = jnp.maximum(h + b1_ref[...], 0.0)
    h = jnp.dot(h.astype(wdt), w2_ref[...], preferred_element_type=jnp.float32)
    h = jnp.maximum(h + b2_ref[...], 0.0)
    o = jnp.dot(h.astype(wdt), w3_ref[...], preferred_element_type=jnp.float32)
    o_ref[...] = (o + b3_ref[...]).astype(o_ref.dtype)


def _mlp_kernel_ktiled(x_ref, w1_ref, b1_ref, w2_ref, b2_ref, w3_ref, b3_ref,
                       o_ref, acc_ref):
    """K-tiled variant: grid axis 1 streams hidden-dim chunks.

    Per chunk c: h_c = relu(x @ W1[:, c] + b1[c]);  acc += h_c @ W2[c, :].
    At the last chunk: out = relu(acc + b2) @ W3 + b3.  W1/W2 are streamed in
    chunks (bounded VMEM), W3/b2/b3 stay resident (single-buffered).
    """
    c = pl.program_id(1)
    wdt = w1_ref.dtype

    @pl.when(c == 0)
    def _():
        acc_ref[...] = jnp.zeros_like(acc_ref)

    x = x_ref[...].astype(wdt)
    h = jnp.dot(x, w1_ref[...], preferred_element_type=jnp.float32)
    h = jnp.maximum(h + b1_ref[...], 0.0)
    acc_ref[...] += jnp.dot(h.astype(wdt), w2_ref[...],
                            preferred_element_type=jnp.float32)

    @pl.when(c == pl.num_programs(1) - 1)
    def _():
        h2 = jnp.maximum(acc_ref[...] + b2_ref[...], 0.0)
        o = jnp.dot(h2.astype(wdt), w3_ref[...],
                    preferred_element_type=jnp.float32)
        o_ref[...] = (o + b3_ref[...]).astype(o_ref.dtype)


@functools.partial(
    jax.jit,
    static_argnames=("tile_m", "compute_dtype", "k_tiled", "hidden_chunk"))
def mlp_forward(x, params, tile_m=512, compute_dtype=None, k_tiled=None,
                hidden_chunk=None):
    """x: [..., D_in]; params: ((w1,b1),(w2,b2),(w3,b3)) with w:[in,out], b:[out].

    compute_dtype: optionally run the matmuls in e.g. jnp.bfloat16 (weights are
    cast; x is cast in-kernel).  Accumulation / bias / ReLU remain f32 and the
    output keeps x.dtype.  k_tiled / hidden_chunk override path selection.
    """
    (w1, b1), (w2, b2), (w3, b3) = params
    d_in, hid = w1.shape
    d_out = w3.shape[1]
    out_dtype = x.dtype

    lead = x.shape[:-1]
    m = 1
    for s in lead:
        m *= s
    if m == 0:
        return jnp.zeros((*lead, d_out), out_dtype)
    x2 = x.reshape(m, d_in)  # NOT cast here: the kernel casts the tile.

    wdt = (jnp.dtype(compute_dtype) if compute_dtype is not None
           else jnp.promote_types(x.dtype, w1.dtype))
    w1 = w1.astype(wdt)
    w2 = w2.astype(wdt)
    w3 = w3.astype(wdt)

    # Lane-dense output: pad the last layer to a multiple of 128 output
    # columns (zeros), so stores are unmasked vst and the final matmul uses
    # more MXU columns.  Sliced back to d_out after the call.
    dop = _round_up(d_out, 128)
    if dop != d_out:
        w3p = jnp.zeros((hid, dop), wdt).at[:, :d_out].set(w3)
        b3p = jnp.zeros((dop,), jnp.float32).at[:d_out].set(
            b3.astype(jnp.float32))
    else:
        w3p, b3p = w3, b3.astype(jnp.float32)

    # Biases stay f32 (1, D): broadcast over the row tile onto the f32 acc.
    b1r = b1.astype(jnp.float32).reshape(1, hid)
    b2r = b2.astype(jnp.float32).reshape(1, hid)
    b3r = b3p.reshape(1, dop)

    w_item = jnp.dtype(wdt).itemsize
    x_item = jnp.dtype(x2.dtype).itemsize
    o_item = jnp.dtype(out_dtype).itemsize

    # Row tile: big (amortize ~0.35us/step, long MXU bursts), never larger
    # than the rounded-up row count, multiple of 16 (covers f32 and bf16).
    tm = min(int(tile_m), _round_up(m, 16))
    tm = max(16, _round_up(tm, 16))

    cap = _vmem_cap_bytes()
    weight_bytes = (d_in * hid + hid * hid + hid * dop) * w_item
    resident_vmem = (
        2 * tm * d_in * x_item          # double-buffered x tile
        + 2 * tm * dop * o_item         # double-buffered out tile
        + weight_bytes                  # single-buffered resident weights
        + (2 * hid + dop) * 4           # biases
        + 2 * tm * hid * 4              # f32 intermediates between MXU bursts
    )
    if k_tiled is None:
        use_ktiled = resident_vmem > int(0.6 * cap)
    else:
        use_ktiled = bool(k_tiled)

    flops = 2 * m * (d_in * hid + hid * hid + hid * dop)
    bytes_accessed = (
        m * d_in * x_item
        + weight_bytes
        + (2 * hid + dop) * 4
        + m * dop * o_item
    )
    cost = pl.CostEstimate(flops=flops, transcendentals=0,
                           bytes_accessed=bytes_accessed)

    if not use_ktiled:
        grid = (pl.cdiv(m, tm),)
        out = pl.pallas_call(
            _mlp_kernel_resident,
            out_shape=jax.ShapeDtypeStruct((m, dop), out_dtype),
            grid_spec=pltpu.PrefetchScalarGridSpec(
                num_scalar_prefetch=0,
                grid=grid,
                in_specs=[
                    pl.BlockSpec((tm, d_in), lambda i: (i, 0)),      # x tile
                    _resident_spec((d_in, hid), lambda i: (0, 0)),   # W1
                    _resident_spec((1, hid), lambda i: (0, 0)),      # b1
                    _resident_spec((hid, hid), lambda i: (0, 0)),    # W2
                    _resident_spec((1, hid), lambda i: (0, 0)),      # b2
                    _resident_spec((hid, dop), lambda i: (0, 0)),    # W3 (padded)
                    _resident_spec((1, dop), lambda i: (0, 0)),      # b3 (padded)
                ],
                out_specs=pl.BlockSpec((tm, dop), lambda i: (i, 0)),
            ),
            compiler_params=pltpu.CompilerParams(
                dimension_semantics=("parallel",),
                vmem_limit_bytes=int(cap),
            ),
            cost_estimate=cost,
        )(x2, w1, b1r, w2, b2r, w3p, b3r)
    else:
        # Hidden-dim chunk: multiple of 128 that divides hid, else full hid.
        if (hidden_chunk is not None and hid % int(hidden_chunk) == 0
                and (int(hidden_chunk) == hid or int(hidden_chunk) % 128 == 0)):
            th = int(hidden_chunk)
        else:
            th = hid
            for cand in (512, 256, 128):
                if hid % cand == 0:
                    th = cand
                    break
        grid = (pl.cdiv(m, tm), hid // th)
        out = pl.pallas_call(
            _mlp_kernel_ktiled,
            out_shape=jax.ShapeDtypeStruct((m, dop), out_dtype),
            grid_spec=pltpu.PrefetchScalarGridSpec(
                num_scalar_prefetch=0,
                grid=grid,
                in_specs=[
                    pl.BlockSpec((tm, d_in), lambda i, c: (i, 0)),    # x tile
                    pl.BlockSpec((d_in, th), lambda i, c: (0, c)),    # W1 chunk
                    pl.BlockSpec((1, th), lambda i, c: (0, c)),       # b1 chunk
                    pl.BlockSpec((th, hid), lambda i, c: (c, 0)),     # W2 chunk
                    _resident_spec((1, hid), lambda i, c: (0, 0)),    # b2
                    _resident_spec((hid, dop), lambda i, c: (0, 0)),  # W3
                    _resident_spec((1, dop), lambda i, c: (0, 0)),    # b3
                ],
                out_specs=pl.BlockSpec((tm, dop), lambda i, c: (i, 0)),
                scratch_shapes=[pltpu.VMEM((tm, hid), jnp.float32)],
            ),
            compiler_params=pltpu.CompilerParams(
                dimension_semantics=("parallel", "arbitrary"),
                vmem_limit_bytes=int(cap),
            ),
            cost_estimate=cost,
        )(x2, w1, b1r, w2, b2r, w3p, b3r)

    if dop != d_out:
        out = out[:, :d_out]
    return out.reshape(*lead, d_out)


def init_mlp_params(key, input_dim, hidden_dim, output_dim, num_layers):
    """Deterministic init mirroring nn.Linear (uniform +/- 1/sqrt(fan_in)).

    Weights are stored already transposed to [in, out] for the kernel.
    """
    h = [hidden_dim] * (num_layers - 1)
    dims = list(zip([input_dim] + h, h + [output_dim]))
    params = []
    for (n_in, n_out) in dims:
        key, kw, kb = jax.random.split(key, 3)
        bound = 1.0 / jnp.sqrt(jnp.float32(n_in))
        w = jax.random.uniform(kw, (n_in, n_out), jnp.float32, -bound, bound)
        b = jax.random.uniform(kb, (n_out,), jnp.float32, -bound, bound)
        params.append((w, b))
    return tuple(params)


def mlp_reference(x, params):
    """Plain-JAX reference matching the PyTorch forward."""
    n = len(params)
    for i, (w, b) in enumerate(params):
        x = x @ w + b
        if i < n - 1:
            x = jnp.maximum(x, 0.0)
    return x


if __name__ == "__main__":
    # Small shapes consistent with GLIP's box-head MLP usage:
    # x: [batch, num_queries, input_dim], 3 layers (input->hidden->hidden->out).
    batch, seq = 2, 8
    input_dim, hidden_dim, output_dim, num_layers = 32, 32, 4, 3

    key = jax.random.PRNGKey(0)
    kx, kp = jax.random.split(key)
    x = jax.random.normal(kx, (batch, seq, input_dim), jnp.float32)
    params = init_mlp_params(kp, input_dim, hidden_dim, output_dim, num_layers)
    ref = mlp_reference(x, params)

    # f32 resident path: exact-precision check against the reference.
    out = jax.block_until_ready(mlp_forward(x, params))
    assert out.shape == (batch, seq, output_dim)
    assert jnp.allclose(out, ref, atol=1e-5, rtol=1e-5)

    # bf16 compute path (f32 accumulation): looser tolerance.
    out_bf16 = jax.block_until_ready(
        mlp_forward(x, params, compute_dtype=jnp.bfloat16))
    assert out_bf16.shape == (batch, seq, output_dim)
    assert jnp.allclose(out_bf16, ref, atol=1e-1, rtol=1e-1)

    # K-tiled path (forced at small scale: hidden=256 streamed in 2 chunks of
    # 128) so the accumulator/init/finalize logic is exercised.
    hidden2 = 256
    params2 = init_mlp_params(kp, input_dim, hidden2, output_dim, num_layers)
    ref2 = mlp_reference(x, params2)
    out2 = jax.block_until_ready(
        mlp_forward(x, params2, k_tiled=True, hidden_chunk=128))
    assert out2.shape == (batch, seq, output_dim)
    assert jnp.allclose(out2, ref2, atol=1e-4, rtol=1e-4)

    print("KERNEL_OK")
</pallas_src>

<mosaic_0001>
module attributes {stable_mosaic.version = 11 : i64} {
  func.func @_mlp_kernel_resident(%arg0: i32, %arg1: memref<16x32xf32, #tpu.memory_space<vmem>>, %arg2: memref<32x32xf32, #tpu.memory_space<vmem>>, %arg3: memref<1x32xf32, #tpu.memory_space<vmem>>, %arg4: memref<32x32xf32, #tpu.memory_space<vmem>>, %arg5: memref<1x32xf32, #tpu.memory_space<vmem>>, %arg6: memref<32x128xf32, #tpu.memory_space<vmem>>, %arg7: memref<1x128xf32, #tpu.memory_space<vmem>>, %arg8: memref<16x128xf32, #tpu.memory_space<vmem>>) attributes {dimension_semantics = [#tpu.dimension_semantics<parallel>], iteration_bounds = array<i64: 1>, scalar_prefetch = 0 : i64, scratch_operands = 0 : i64, tpu.core_type = #tpu.core_type<tc>, window_params = [{transform_indices = @transform_0, window_bounds = array<i64: 16, 32>}, {pipeline_mode = #tpu.pipeline_mode<synchronous>, transform_indices = @transform_1, window_bounds = array<i64: 32, 32>}, {pipeline_mode = #tpu.pipeline_mode<synchronous>, transform_indices = @transform_2, window_bounds = array<i64: 1, 32>}, {pipeline_mode = #tpu.pipeline_mode<synchronous>, transform_indices = @transform_3, window_bounds = array<i64: 32, 32>}, {pipeline_mode = #tpu.pipeline_mode<synchronous>, transform_indices = @transform_4, window_bounds = array<i64: 1, 32>}, {pipeline_mode = #tpu.pipeline_mode<synchronous>, transform_indices = @transform_5, window_bounds = array<i64: 32, 128>}, {pipeline_mode = #tpu.pipeline_mode<synchronous>, transform_indices = @transform_6, window_bounds = array<i64: 1, 128>}, {transform_indices = @transform_7, window_bounds = array<i64: 16, 128>}]} {
    %c0 = arith.constant 0 : index
    %c0_0 = arith.constant 0 : index
    %0 = vector.load %arg1[%c0, %c0_0] : memref<16x32xf32, #tpu.memory_space<vmem>>, vector<16x32xf32>
    %c0_1 = arith.constant 0 : index
    %c0_2 = arith.constant 0 : index
    %1 = vector.load %arg2[%c0_1, %c0_2] : memref<32x32xf32, #tpu.memory_space<vmem>>, vector<32x32xf32>
    %cst = arith.constant dense<0.000000e+00> : vector<16x32xf32>
    %2 = tpu.matmul %0, %1, %cst {dimension_numbers = #tpu.dot_dimension_numbers<[1], [0], [0], [1], [0, 0, 1, 1], [], []>} : vector<16x32xf32>, vector<32x32xf32>, vector<16x32xf32> -> vector<16x32xf32>
    %c0_3 = arith.constant 0 : index
    %c0_4 = arith.constant 0 : index
    %3 = vector.load %arg3[%c0_3, %c0_4] : memref<1x32xf32, #tpu.memory_space<vmem>>, vector<1x32xf32>
    %4 = vector.broadcast %3 : vector<1x32xf32> to vector<16x32xf32>
    %5 = arith.addf %2, %4 : vector<16x32xf32>
    %cst_5 = arith.constant 0.000000e+00 : f32
    %6 = vector.broadcast %cst_5 : f32 to vector<16x32xf32>
    %7 = arith.maximumf %5, %6 : vector<16x32xf32>
    %c0_6 = arith.constant 0 : index
    %c0_7 = arith.constant 0 : index
    %8 = vector.load %arg4[%c0_6, %c0_7] : memref<32x32xf32, #tpu.memory_space<vmem>>, vector<32x32xf32>
    %cst_8 = arith.constant dense<0.000000e+00> : vector<16x32xf32>
    %9 = tpu.matmul %7, %8, %cst_8 {dimension_numbers = #tpu.dot_dimension_numbers<[1], [0], [0], [1], [0, 0, 1, 1], [], []>} : vector<16x32xf32>, vector<32x32xf32>, vector<16x32xf32> -> vector<16x32xf32>
    %c0_9 = arith.constant 0 : index
    %c0_10 = arith.constant 0 : index
    %10 = vector.load %arg5[%c0_9, %c0_10] : memref<1x32xf32, #tpu.memory_space<vmem>>, vector<1x32xf32>
    %11 = vector.broadcast %10 : vector<1x32xf32> to vector<16x32xf32>
    %12 = arith.addf %9, %11 : vector<16x32xf32>
    %cst_11 = arith.constant 0.000000e+00 : f32
    %13 = vector.broadcast %cst_11 : f32 to vector<16x32xf32>
    %14 = arith.maximumf %12, %13 : vector<16x32xf32>
    %c0_12 = arith.constant 0 : index
    %c0_13 = arith.constant 0 : index
    %15 = vector.load %arg6[%c0_12, %c0_13] : memref<32x128xf32, #tpu.memory_space<vmem>>, vector<32x128xf32>
    %cst_14 = arith.constant dense<0.000000e+00> : vector<16x128xf32>
    %16 = tpu.matmul %14, %15, %cst_14 {dimension_numbers = #tpu.dot_dimension_numbers<[1], [0], [0], [1], [0, 0, 1, 1], [], []>} : vector<16x32xf32>, vector<32x128xf32>, vector<16x128xf32> -> vector<16x128xf32>
    %c0_15 = arith.constant 0 : index
    %c0_16 = arith.constant 0 : index
    %17 = vector.load %arg7[%c0_15, %c0_16] : memref<1x128xf32, #tpu.memory_space<vmem>>, vector<1x128xf32>
    %18 = vector.broadcast %17 : vector<1x128xf32> to vector<16x128xf32>
    %19 = arith.addf %16, %18 : vector<16x128xf32>
    %c0_17 = arith.constant 0 : index
    %c0_18 = arith.constant 0 : index
    %20 = vector.load %arg8[%c0_17, %c0_18] : memref<16x128xf32, #tpu.memory_space<vmem>>, vector<16x128xf32>
    tpu.vector_store %arg8[%c0_17, %c0_18], %19 {strides = array<i32>} : memref<16x128xf32, #tpu.memory_space<vmem>>, vector<16x128xf32>,
    return
  }
  func.func @transform_0(%arg0: i32) -> (i32, i32) {
    %c0_i32 = arith.constant 0 : i32
    %c0_i32_0 = arith.constant 0 : i32
    return %arg0, %c0_i32 : i32, i32
  }
  func.func @transform_1(%arg0: i32) -> (i32, i32) {
    %c0_i32 = arith.constant 0 : i32
    %c0_i32_0 = arith.constant 0 : i32
    %c0_i32_1 = arith.constant 0 : i32
    return %c0_i32, %c0_i32_0 : i32, i32
  }
  func.func @transform_2(%arg0: i32) -> (i32, i32) {
    %c0_i32 = arith.constant 0 : i32
    %c0_i32_0 = arith.constant 0 : i32
    %c0_i32_1 = arith.constant 0 : i32
    return %c0_i32, %c0_i32_0 : i32, i32
  }
  func.func @transform_3(%arg0: i32) -> (i32, i32) {
    %c0_i32 = arith.constant 0 : i32
    %c0_i32_0 = arith.constant 0 : i32
    %c0_i32_1 = arith.constant 0 : i32
    return %c0_i32, %c0_i32_0 : i32, i32
  }
  func.func @transform_4(%arg0: i32) -> (i32, i32) {
    %c0_i32 = arith.constant 0 : i32
    %c0_i32_0 = arith.constant 0 : i32
    %c0_i32_1 = arith.constant 0 : i32
    return %c0_i32, %c0_i32_0 : i32, i32
  }
  func.func @transform_5(%arg0: i32) -> (i32, i32) {
    %c0_i32 = arith.constant 0 : i32
    %c0_i32_0 = arith.constant 0 : i32
    %c0_i32_1 = arith.constant 0 : i32
    return %c0_i32, %c0_i32_0 : i32, i32
  }
  func.func @transform_6(%arg0: i32) -> (i32, i32) {
    %c0_i32 = arith.constant 0 : i32
    %c0_i32_0 = arith.constant 0 : i32
    %c0_i32_1 = arith.constant 0 : i32
    return %c0_i32, %c0_i32_0 : i32, i32
  }
  func.func @transform_7(%arg0: i32) -> (i32, i32) {
    %c0_i32 = arith.constant 0 : i32
    %c0_i32_0 = arith.constant 0 : i32
    return %arg0, %c0_i32 : i32, i32
  }
}

</mosaic_0001>

<bundles_post_ra>
// kernel: mlp_forward.1
= control target key start
LH: loop header
LB: loop body
LE: loop exit
PB: predicated region body
PF: predicated region fallthrough
CT: control target
= control target key end

     0   :  { %vm39_vm0 = vcmask 261120   ;;  %s478_s1 = inlined_call_operand.vmem [shape: f32[32,32], index: 1, kind: input, shape index: {}]   ;;  %s479_s0 = inlined_call_operand.vmem [shape: f32[16,32], index: 0, kind: input, shape index: {}]   ;;  %s480_s3 = inlined_call_operand.vmem [shape: f32[32,32], index: 3, kind: input, shape index: {}]   ;;  %s481_s2 = inlined_call_operand.vmem [shape: f32[1,32], index: 2, kind: input, shape index: {}]   ;;  %s482_s5 = inlined_call_operand.vmem [shape: f32[32,128], index: 5, kind: input, shape index: {}]   ;;  %s483_s4 = inlined_call_operand.vmem [shape: f32[1,32], index: 4, kind: input, shape index: {}]   ;;  %s484_s6 = inlined_call_operand.vmem [shape: f32[1,128], index: 6, kind: input, shape index: {}]   ;;  %s485_s7 = inlined_call_operand.vmem [shape: f32[16,128], index: 7, kind: output, shape index: {}]  }
   0x1   :  { %v31_v0 = vld [vmem:[%s478_s1 + $0x18] sm:$0xff]  ;;  %v30_v1 = vld [vmem:[%s478_s1 + $0x10] sm:$0xff]  ;;  %v26_v2 = vld [vmem:[%s479_s0] sm:$0xff] }
   0x2   :  { %342 = vmatprep.subr.mxu0 %v31_v0  ;;  %v29_v3 = vld [vmem:[%s478_s1 + $0x8] sm:$0xff]  ;;  %350 = vmatprep.mubr.msk.f32.mxu0 %vm39_vm0, %v26_v2  ;;  %v28_v4 = vld [vmem:[%s478_s1] sm:$0xff]  ;;  %v126_v6 = vld [vmem:[%s480_s3 + $0x18] sm:$0xff] }
   0x3   :  { %343 = vmatpush3.msra.mxu0 %v31_v0  ;;  %v27_v5 = vld [vmem:[%s479_s0 + $0x8] sm:$0xff]  ;;  %353 = vmatprep.subr.mxu1 %v126_v6  ;;  %v125_v7 = vld [vmem:[%s480_s3 + $0x10] sm:$0xff]  ;;  %v123_v9 = vld [vmem:[%s480_s3] sm:$0xff] }
   0x4   :  { %344 = vmatprep.subr.mxu0 %v30_v1  ;;  %354 = vmatpush3.msra.mxu1 %v126_v6  ;;  %v124_v8 = vld [vmem:[%s480_s3 + $0x8] sm:$0xff]  ;;  %v315_v10 = vld [vmem:[%s481_s2] ss:$0 sm:$0xff]  ;;  %v220_v17 = vld [vmem:[%s482_s5 + $0x18] sm:$0xff] }
   0x5   :  { %345 = vmatpush3.msra.mxu0 %v30_v1  ;;  %355 = vmatprep.subr.mxu1 %v125_v7  ;;  %v219_v18 = vld [vmem:[%s482_s5 + $0x10] sm:$0xff]  ;;  %v218_v19 = vld [vmem:[%s482_s5 + $0x8] sm:$0xff]  ;;  %v217_v20 = vld [vmem:[%s482_s5] sm:$0xff] }
   0x6   :  { %346 = vmatprep.subr.mxu0 %v29_v3  ;;  %356 = vmatpush3.msra.mxu1 %v125_v7  ;;  %v318_v21 = vld [vmem:[%s483_s4] ss:$0 sm:$0xff] }
   0x7   :  { %347 = vmatpush3.msra.mxu0 %v29_v3  ;;  %357 = vmatprep.subr.mxu1 %v124_v8  ;;  %v321_v28 = vld [vmem:[%s484_s6] ss:$0 sm:$0xff] }
   0x8   :  { %348 = vmatprep.subr.mxu0 %v28_v4  ;;  %358 = vmatpush3.msra.mxu1 %v124_v8 }
   0x9   :  { %349 = vmatpush3.msra.mxu0 %v28_v4  ;;  %359 = vmatprep.subr.mxu1 %v123_v9 }
   0xa   :  { %351 = vmatmul.mubr.msk.f32.vlgmr.msra.gmra.mxu0 %vm39_vm0, %v27_v5  ;;  %360 = vmatpush3.msra.mxu1 %v123_v9 }
   0xb   :  { %364 = vmatprep.subr.mxu0 %v220_v17 }
   0xc   :  { %365 = vmatpush3.msra.mxu0 %v220_v17 }
   0xd   :  { %366 = vmatprep.subr.mxu0 %v219_v18 }
   0xe   :  { %367 = vmatpush3.msra.mxu0 %v219_v18 }
   0xf   :  { %368 = vmatprep.subr.mxu0 %v218_v19 }
  0x10   :  { %369 = vmatpush3.msra.mxu0 %v218_v19 }
  0x11   :  { %370 = vmatprep.subr.mxu0 %v217_v20 }
  0x12   :  { %371 = vmatpush3.msra.mxu0 %v217_v20 }
  0xca   :  { %v352_v11 = vpop.f32.mrf.mxu0 }
  0xcb   :  { %v118_v12 = vadd.f32 %v352_v11, %v315_v10 }
  0xcc   :  { %v112_v13 = vpop.f32.mrf.mxu0 }
  0xcd   :  { %v113_v14 = vadd.f32 %v315_v10, %v112_v13  ;;  %v122_v16 = vmax.f32 %v118_v12, 0.0 }
  0xcf   :  { %v121_v15 = vmax.f32 %v113_v14, 0.0 }
  0xd1   :  { %361 = vmatprep.mubr.msk.f32.mxu1 %vm39_vm0, %v121_v15 }
  0xd2   :  { %362 = vmatmul.mubr.msk.f32.vlgmr.msra.gmra.mxu1 %vm39_vm0, %v122_v16 }
 0x192   :  { %v363_v22 = vpop.f32.mrf.mxu1 }
 0x193   :  { %v212_v23 = vadd.f32 %v363_v22, %v318_v21 }
 0x194   :  { %v206_v24 = vpop.f32.mrf.mxu1 }
 0x195   :  { %v207_v25 = vadd.f32 %v318_v21, %v206_v24  ;;  %v216_v27 = vmax.f32 %v212_v23, 0.0 }
 0x197   :  { %v215_v26 = vmax.f32 %v207_v25, 0.0 }
 0x199   :  { %372 = vmatprep.mubr.msk.f32.mxu0 %vm39_vm0, %v215_v26 }
 0x19a   :  { %373 = vmatmul.mubr.msk.f32.vlgmr.msra.gmra.mxu0 %vm39_vm0, %v216_v27 }
 0x25a   :  { %v374_v29 = vpop.f32.mrf.mxu0 }
 0x25b   :  { %v306_v30 = vadd.f32 %v374_v29, %v321_v28 }
 0x25c   :  { %v300_v31 = vpop.f32.mrf.mxu0 }
 0x25d   :  { %310 = vst [vmem:[%s485_s7 + $0x8] sm:$0xff] %v306_v30  ;;  %v301_v32 = vadd.f32 %v321_v28, %v300_v31 }
 0x25f   :  { %309 = vst [vmem:[%s485_s7] sm:$0xff] %v301_v32 }

</bundles_post_ra>
